<compile_context>
chip_gen: v6e
topology: v6e:2x2x1
jax: 0.10.0
libtpu: 0.0.40
codegen_flags: <defaults>
</compile_context>

<pallas_src>
import jax
import jax.numpy as jnp
from jax.experimental import pallas as pl
from jax.experimental.pallas import tpu as pltpu

# Same numbers as the PyTorch module's __init__.
_FILTERS = {
    "sobel": (((-1, 0, 1), (-2, 0, 2), (-1, 0, 1)),
              ((1, 2, 1), (0, 0, 0), (-1, -2, -1))),
    "scharr": (((-3, 0, 3), (-10, 0, 10), (-3, 0, 3)),
               ((3, 10, 3), (0, 0, 0), (-3, -10, -3))),
}


def _grouped_taps(filter_type):
    """Non-zero taps of W1 + W2, grouped by |weight| -> (|w|, pos, neg)."""
    w1, w2 = _FILTERS[filter_type]
    groups = {}
    for di in range(3):
        for dj in range(3):
            w = float(w1[di][dj] + w2[di][dj])
            if w == 0.0:
                continue
            pos, neg = groups.setdefault(abs(w), ([], []))
            (pos if w > 0.0 else neg).append((di, dj))
    return tuple((aw, tuple(pos), tuple(neg))
                 for aw, (pos, neg) in sorted(groups.items()))


def _make_kernel(groups):
    def kernel(x_ref, out_ref, pad_ref):
        # x_ref  : (TB, H, W)      input block
        # out_ref: (TB, H, W)      output block
        # pad_ref: (TB, H+2, W+2)  VMEM scratch (zero border, interior = x)
        TB, H, W = out_ref.shape

        # Zero only the 1-pixel border (cheap, O(H+W)); re-done every step so
        # a "parallel" batch axis needs no cross-step scratch state.
        zrow = jnp.zeros((TB, 1, W + 2), jnp.float32)
        zcol = jnp.zeros((TB, H + 2, 1), jnp.float32)
        pad_ref[:, 0:1, :] = zrow
        pad_ref[:, H + 1:H + 2, :] = zrow
        pad_ref[:, :, 0:1] = zcol
        pad_ref[:, :, W + 1:W + 2] = zcol
        pad_ref[:, 1:H + 1, 1:W + 1] = x_ref[...].astype(jnp.float32)

        # Fused (W1 + W2) cross-correlation: shifted windows grouped by
        # |weight| -> one scale per group (sobel: 1 mul total).
        acc = None
        for aw, pos, neg in groups:
            g = None
            for di, dj in pos:
                t = pad_ref[:, di:di + H, dj:dj + W]
                g = t if g is None else g + t
            for di, dj in neg:
                t = pad_ref[:, di:di + H, dj:dj + W]
                g = -t if g is None else g - t
            term = g if aw == 1.0 else aw * g
            acc = term if acc is None else acc + term
        out_ref[...] = acc.astype(out_ref.dtype)

    return kernel


def grad_filter(x, filter_type="sobel"):
    """x: (N, 1, H, W) -> conv1(x) + conv2(x), shape (N, 1, H, W)."""
    N, C, H, W = x.shape
    assert C == 1, "GradFilter operates on single-channel input"
    x3 = x.reshape(N, H, W)

    # Batch several images per grid step: target ~2 MiB of input per block.
    # Footprint: 2x input + 2x output (double-buffered) + padded f32 scratch
    # ~= 10-11 MiB, under the default scoped VMEM limit on v5e/v6e/v7x.
    bytes_per_img = H * W * x.dtype.itemsize
    budget = 2 * 1024 * 1024
    tb = max(1, min(N, budget // max(bytes_per_img, 1)))
    while N % tb != 0:  # keep the grid exact
        tb -= 1
    grid = (N // tb,)

    kernel = _make_kernel(_grouped_taps(filter_type))

    out = pl.pallas_call(
        kernel,
        out_shape=jax.ShapeDtypeStruct((N, H, W), x.dtype),
        grid_spec=pltpu.PrefetchScalarGridSpec(
            num_scalar_prefetch=0,
            grid=grid,
            in_specs=[pl.BlockSpec((tb, H, W), lambda n: (n, 0, 0))],
            out_specs=pl.BlockSpec((tb, H, W), lambda n: (n, 0, 0)),
            scratch_shapes=[pltpu.VMEM((tb, H + 2, W + 2), jnp.float32)],
        ),
        compiler_params=pltpu.CompilerParams(
            dimension_semantics=("parallel",)),
    )(x3)

    return out.reshape(N, 1, H, W)


def _reference(x, filter_type="sobel"):
    """Pure-JAX reference: two separate 3x3 cross-correlations, summed."""
    w1, w2 = _FILTERS[filter_type]
    k1 = jnp.array(w1, dtype=jnp.float32).reshape(1, 1, 3, 3)
    k2 = jnp.array(w2, dtype=jnp.float32).reshape(1, 1, 3, 3)
    dn = jax.lax.conv_dimension_numbers(x.shape, k1.shape,
                                        ("NCHW", "OIHW", "NCHW"))
    o1 = jax.lax.conv_general_dilated(x, k1, (1, 1), ((1, 1), (1, 1)),
                                      dimension_numbers=dn)
    o2 = jax.lax.conv_general_dilated(x, k2, (1, 1), ((1, 1), (1, 1)),
                                      dimension_numbers=dn)
    return o1 + o2


if __name__ == "__main__":
    key = jax.random.PRNGKey(0)

    cases = [
        ((2, 1, 16, 16), "sobel"),    # module-default small shape
        ((4, 1, 16, 128), "sobel"),   # lane-dense width, multi-image block
        ((2, 1, 16, 16), "scharr"),   # other filter type supported by module
        ((8, 1, 24, 40), "sobel"),    # odd H/W, multi-image block
    ]
    for i, (shape, ftype) in enumerate(cases):
        x = jax.random.normal(jax.random.fold_in(key, i), shape,
                              dtype=jnp.float32)
        y = jax.block_until_ready(grad_filter(x, ftype))
        y_ref = _reference(x, ftype)
        assert y.shape == shape
        assert jnp.allclose(y, y_ref, atol=1e-4, rtol=1e-5), (shape, ftype)

    print("KERNEL_OK")
</pallas_src>

<mosaic_0001>
module attributes {stable_mosaic.version = 11 : i64} {
  func.func @kernel(%arg0: i32, %arg1: memref<2x16x16xf32, #tpu.memory_space<vmem>>, %arg2: memref<2x16x16xf32, #tpu.memory_space<vmem>>, %arg3: memref<2x18x18xf32, #tpu.memory_space<vmem>>) attributes {dimension_semantics = [#tpu.dimension_semantics<parallel>], iteration_bounds = array<i64: 1>, scalar_prefetch = 0 : i64, scratch_operands = 1 : i64, tpu.core_type = #tpu.core_type<tc>, window_params = [{transform_indices = @transform_0, window_bounds = array<i64: 2, 16, 16>}, {transform_indices = @transform_1, window_bounds = array<i64: 2, 16, 16>}]} {
    %cst = arith.constant 0.000000e+00 : f32
    %0 = vector.broadcast %cst : f32 to vector<2x1x18xf32>
    %cst_0 = arith.constant 0.000000e+00 : f32
    %1 = vector.broadcast %cst_0 : f32 to vector<2x18x1xf32>
    %c0 = arith.constant 0 : index
    %c0_1 = arith.constant 0 : index
    %c0_2 = arith.constant 0 : index
    %2 = vector.load %arg3[%c0, %c0_1, %c0_2] : memref<2x18x18xf32, #tpu.memory_space<vmem>>, vector<2x1x18xf32>
    tpu.vector_store %arg3[%c0, %c0_1, %c0_2], %0 {strides = array<i32>} : memref<2x18x18xf32, #tpu.memory_space<vmem>>, vector<2x1x18xf32>,
    %c0_3 = arith.constant 0 : index
    %c17 = arith.constant 17 : index
    %c0_4 = arith.constant 0 : index
    %3 = vector.load %arg3[%c0_3, %c17, %c0_4] : memref<2x18x18xf32, #tpu.memory_space<vmem>>, vector<2x1x18xf32>
    tpu.vector_store %arg3[%c0_3, %c17, %c0_4], %0 {strides = array<i32>} : memref<2x18x18xf32, #tpu.memory_space<vmem>>, vector<2x1x18xf32>,
    %c0_5 = arith.constant 0 : index
    %c0_6 = arith.constant 0 : index
    %c0_7 = arith.constant 0 : index
    %4 = vector.load %arg3[%c0_5, %c0_6, %c0_7] : memref<2x18x18xf32, #tpu.memory_space<vmem>>, vector<2x18x1xf32>
    tpu.vector_store %arg3[%c0_5, %c0_6, %c0_7], %1 {strides = array<i32>} : memref<2x18x18xf32, #tpu.memory_space<vmem>>, vector<2x18x1xf32>,
    %c0_8 = arith.constant 0 : index
    %c0_9 = arith.constant 0 : index
    %c17_10 = arith.constant 17 : index
    %5 = vector.load %arg3[%c0_8, %c0_9, %c17_10] : memref<2x18x18xf32, #tpu.memory_space<vmem>>, vector<2x18x1xf32>
    tpu.vector_store %arg3[%c0_8, %c0_9, %c17_10], %1 {strides = array<i32>} : memref<2x18x18xf32, #tpu.memory_space<vmem>>, vector<2x18x1xf32>,
    %c0_11 = arith.constant 0 : index
    %c0_12 = arith.constant 0 : index
    %c0_13 = arith.constant 0 : index
    %6 = vector.load %arg1[%c0_11, %c0_12, %c0_13] : memref<2x16x16xf32, #tpu.memory_space<vmem>>, vector<2x16x16xf32>
    %c0_14 = arith.constant 0 : index
    %c1 = arith.constant 1 : index
    %c1_15 = arith.constant 1 : index
    %7 = vector.load %arg3[%c0_14, %c1, %c1_15] : memref<2x18x18xf32, #tpu.memory_space<vmem>>, vector<2x16x16xf32>
    tpu.vector_store %arg3[%c0_14, %c1, %c1_15], %6 {strides = array<i32>} : memref<2x18x18xf32, #tpu.memory_space<vmem>>, vector<2x16x16xf32>,
    %c0_16 = arith.constant 0 : index
    %c0_17 = arith.constant 0 : index
    %c1_18 = arith.constant 1 : index
    %8 = vector.load %arg3[%c0_16, %c0_17, %c1_18] : memref<2x18x18xf32, #tpu.memory_space<vmem>>, vector<2x16x16xf32>
    %c0_19 = arith.constant 0 : index
    %c0_20 = arith.constant 0 : index
    %c2 = arith.constant 2 : index
    %9 = vector.load %arg3[%c0_19, %c0_20, %c2] : memref<2x18x18xf32, #tpu.memory_space<vmem>>, vector<2x16x16xf32>
    %10 = arith.addf %8, %9 : vector<2x16x16xf32>
    %c0_21 = arith.constant 0 : index
    %c1_22 = arith.constant 1 : index
    %c2_23 = arith.constant 2 : index
    %11 = vector.load %arg3[%c0_21, %c1_22, %c2_23] : memref<2x18x18xf32, #tpu.memory_space<vmem>>, vector<2x16x16xf32>
    %12 = arith.addf %10, %11 : vector<2x16x16xf32>
    %c0_24 = arith.constant 0 : index
    %c1_25 = arith.constant 1 : index
    %c0_26 = arith.constant 0 : index
    %13 = vector.load %arg3[%c0_24, %c1_25, %c0_26] : memref<2x18x18xf32, #tpu.memory_space<vmem>>, vector<2x16x16xf32>
    %14 = arith.subf %12, %13 : vector<2x16x16xf32>
    %c0_27 = arith.constant 0 : index
    %c2_28 = arith.constant 2 : index
    %c0_29 = arith.constant 0 : index
    %15 = vector.load %arg3[%c0_27, %c2_28, %c0_29] : memref<2x18x18xf32, #tpu.memory_space<vmem>>, vector<2x16x16xf32>
    %16 = arith.subf %14, %15 : vector<2x16x16xf32>
    %c0_30 = arith.constant 0 : index
    %c2_31 = arith.constant 2 : index
    %c1_32 = arith.constant 1 : index
    %17 = vector.load %arg3[%c0_30, %c2_31, %c1_32] : memref<2x18x18xf32, #tpu.memory_space<vmem>>, vector<2x16x16xf32>
    %18 = arith.subf %16, %17 : vector<2x16x16xf32>
    %cst_33 = arith.constant 2.000000e+00 : f32
    %19 = vector.broadcast %cst_33 : f32 to vector<2x16x16xf32>
    %20 = arith.mulf %19, %18 : vector<2x16x16xf32>
    %c0_34 = arith.constant 0 : index
    %c0_35 = arith.constant 0 : index
    %c0_36 = arith.constant 0 : index
    %21 = vector.load %arg2[%c0_34, %c0_35, %c0_36] : memref<2x16x16xf32, #tpu.memory_space<vmem>>, vector<2x16x16xf32>
    tpu.vector_store %arg2[%c0_34, %c0_35, %c0_36], %20 {strides = array<i32>} : memref<2x16x16xf32, #tpu.memory_space<vmem>>, vector<2x16x16xf32>,
    return
  }
  func.func @transform_0(%arg0: i32) -> (i32, i32, i32) {
    %c0_i32 = arith.constant 0 : i32
    %c0_i32_0 = arith.constant 0 : i32
    %c0_i32_1 = arith.constant 0 : i32
    return %arg0, %c0_i32, %c0_i32_0 : i32, i32, i32
  }
  func.func @transform_1(%arg0: i32) -> (i32, i32, i32) {
    %c0_i32 = arith.constant 0 : i32
    %c0_i32_0 = arith.constant 0 : i32
    %c0_i32_1 = arith.constant 0 : i32
    return %arg0, %c0_i32, %c0_i32_0 : i32, i32, i32
  }
}

</mosaic_0001>

<bundles_post_ra>
// kernel: tpu_custom_call.1
= control target key start
LH: loop header
LB: loop body
LE: loop exit
PB: predicated region body
PF: predicated region fallthrough
CT: control target
= control target key end

     0   :  { %6 = vsyncpa [#allocation4], 0  ;;  %s311_s0 = inlined_call_operand.hbm [shape: f32[2,16,16], index: 0, kind: input, shape index: {}]   ;;  %s312_s1 = inlined_call_operand.hbm [shape: f32[2,16,16], index: 1, kind: output, shape index: {}]  }
   0x1   :  { %7 = vsyncpa [#allocation5], 0  ;;  %s254_s6 = smov [#allocation3]  }
   0x2   :  { %s13_s7 = sshll.u32 %s254_s6, 4  ;;  %s14_s7 = int_to_ptr.vmem [resolvable:$true] %s13_s7 }
   0x3   :  { %s218_s8 = scalar_lea.vmem %s14_s7, 512  ;;  %p223_p1 = scmp.lt.s32.totalorder %s14_s7, %s14_s7 }
   0x4   :  { %p219_p0 = scmp.ne.s32.totalorder %s14_s7, %s218_s8  ;;  %p224_p2 = scmp.lt.s32.totalorder %s218_s8, %s218_s8 }
   0x6   :  { %p225_p3 = por %p224_p2, %p223_p1 }
   0x8   :  { %p226_p4 = pnand %p225_p3, %p219_p0 }
   0xa   :  { %229 = shalt.err (!%p226_p4)
}
   0xb   :  { %s255_s9 = smov 128   ;;  %s256_s10 = smov 8  }
   0xc   :  { %19 = dma.hbm_to_vmem [thread:$0]  %s311_s0, 512, %s14_s7, [#allocation4], %s255_s9, %s255_s9, %s256_s10  }
   0xd   :  { %250 = dma.done.wait [#allocation4], 512  }
   0xe   :  { %251 = vsyncadd [#allocation4], 4294966784  ;;  %vm23_vm0 = vcmask 139264   ;;  %vm28_vm1 = vcmask 7168   ;;  %vm36_vm2 = vcmask 146568   ;;  %v257_v0 = vmov 0.0  }
   0xf   :  { %25 = vst.msk [vmem:[#allocation2 + $0x18] sm:$0x1] %vm23_vm0, %v257_v0  ;;  %24 = vst.msk [vmem:[#allocation2] sm:$0x1] %vm23_vm0, %v257_v0  ;;  %vm31_vm3 = vcmask 1024   ;;  %vm39_vm4 = vcmask 140424  }
  0x10   :  { %34 = vst.msk [vmem:[#allocation2 + $0x20] sm:$0xff] %vm28_vm1, %v257_v0  ;;  %30 = vst.msk [vmem:[#allocation2 + $0x8] sm:$0xff] %vm28_vm1, %v257_v0  ;;  %v46_v1 = vld [vmem:[#allocation3 + $0x10] sm:$0xff]  ;;  %v44_v2 = vld [vmem:[#allocation3] sm:$0xff]  ;;  %s258_s0 = smov 1   ;;  %vm64_vm5 = vcmask 138248  }
  0x11   :  { %26 = vst.msk [vmem:[#allocation2 + $0x11] sm:$0x1] %vm23_vm0, %v257_v0  ;;  %27 = vst.msk [vmem:[#allocation2 + $0x29] sm:$0x1] %vm23_vm0, %v257_v0  ;;  %56 = vrot.lane.b32.xlu1 %v46_v1, %s258_s0  ;;  %52 = vrot.lane.b32.xlu0 %v44_v2, %s258_s0  ;;  %v47_v3 = vld [vmem:[#allocation3 + $0x18] sm:$0xff]  ;;  %v45_v4 = vld [vmem:[#allocation3 + $0x8] sm:$0xff] }
  0x12   :  { %33 = vst.msk [vmem:[#allocation2 + $0x18] sm:$0xff] %vm28_vm1, %v257_v0  ;;  %29 = vst.msk [vmem:[#allocation2] sm:$0xff] %vm28_vm1, %v257_v0  ;;  %s259_s13 = smov 127   ;;  %vm181_vm6 = vcmask 130048   ;;  %s260_s14 = smov [#allocation6]  }
  0x13   :  { %42 = vst.msk [vmem:[#allocation2 + $0x20] sm:$0xff] %vm36_vm2, %v257_v0  ;;  %38 = vst.msk [vmem:[#allocation2 + $0x8] sm:$0xff] %vm36_vm2, %v257_v0  ;;  %s191_s15 = sshll.u32 %s260_s14, 4  ;;  %s192_s15 = int_to_ptr.vmem [resolvable:$true] %s191_s15 }
  0x14   :  { %35 = vst.msk [vmem:[#allocation2 + $0x28] sm:$0x3] %vm31_vm3, %v257_v0  ;;  %32 = vst.msk [vmem:[#allocation2 + $0x10] sm:$0x3] %vm31_vm3, %v257_v0  ;;  %s230_s16 = scalar_lea.vmem %s192_s15, 512  ;;  %p235_p6 = scmp.lt.s32.totalorder %s192_s15, %s192_s15 }
  0x15   :  { %41 = vst.msk [vmem:[#allocation2 + $0x18] sm:$0xff] %vm36_vm2, %v257_v0  ;;  %37 = vst.msk [vmem:[#allocation2] sm:$0xff] %vm36_vm2, %v257_v0  ;;  %58 = vrot.lane.b32.xlu1 %v47_v3, %s258_s0  ;;  %54 = vrot.lane.b32.xlu0 %v45_v4, %s258_s0  ;;  %p231_p5 = scmp.ne.s32.totalorder %s192_s15, %s230_s16  ;;  %p236_p7 = scmp.lt.s32.totalorder %s230_s16, %s230_s16 }
  0x16   :  { %43 = vst.msk [vmem:[#allocation2 + $0x28] sm:$0x3] %vm39_vm4, %v257_v0  ;;  %40 = vst.msk [vmem:[#allocation2 + $0x10] sm:$0x3] %vm39_vm4, %v257_v0 }
  0x17   :  { %p237_p8 = por %p236_p7, %p235_p6 }
  0x19   :  { %p238_p9 = pnand %p237_p8, %p231_p5 }
  0x83   :  { %v57_v5 = vpop.permute.xlu1 %56  ;;  %v53_v6 = vpop.permute.xlu0 %52 }
  0x84   :  { %67 = vst.msk [vmem:[#allocation2 + $0x19] sm:$0xff] %vm64_vm5, %v57_v5  ;;  %65 = vst.msk [vmem:[#allocation2 + $0x1] sm:$0xff] %vm64_vm5, %v53_v6 }
  0x87   :  { %v59_v7 = vpop.permute.xlu1 %58  ;;  %v55_v8 = vpop.permute.xlu0 %54 }
  0x88   :  { %68 = vst.msk [vmem:[#allocation2 + $0x21] sm:$0xff] %vm64_vm5, %v59_v7  ;;  %66 = vst.msk [vmem:[#allocation2 + $0x9] sm:$0xff] %vm64_vm5, %v55_v8 }
  0x8b   :  { %v69_v9 = vld [vmem:[#allocation2] sm:$0xff]  ;;  %v71_v10 = vld [vmem:[#allocation2 + $0x18] sm:$0xff] }
  0x8c   :  { %77 = vrot.lane.b32.xlu0 %v69_v9, %s259_s13  ;;  %v93_v13 = vld [vmem:[#allocation2 + $0x1] sm:$0xff]  ;;  %v95_v15 = vld [vmem:[#allocation2 + $0x19] sm:$0xff] }
  0x8f   :  { %v70_v11 = vld [vmem:[#allocation2 + $0x8] sm:$0xff]  ;;  %v72_v12 = vld [vmem:[#allocation2 + $0x20] sm:$0xff] }
  0x90   :  { %79 = vrot.lane.b32.xlu1 %v70_v11, %s259_s13  ;;  %81 = vrot.lane.b32.xlu0 %v71_v10, %s259_s13  ;;  %v94_v14 = vld [vmem:[#allocation2 + $0x9] sm:$0xff]  ;;  %v96_v16 = vld [vmem:[#allocation2 + $0x21] sm:$0xff] }
  0x91   :  { %v133_v17 = vld [vmem:[#allocation2 + $0x2] sm:$0xff]  ;;  %v134_v18 = vld [vmem:[#allocation2 + $0xa] sm:$0xff]  ;;  %v135_v19 = vld [vmem:[#allocation2 + $0x1a] sm:$0xff] }
  0x92   :  { %v136_v20 = vld [vmem:[#allocation2 + $0x22] sm:$0xff] }
  0x94   :  { %83 = vrot.lane.b32.xlu1 %v72_v12, %s259_s13  ;;  %101 = vrot.lane.b32.xlu0 %v93_v13, %s259_s13 }
  0x98   :  { %103 = vrot.lane.b32.xlu1 %v94_v14, %s259_s13  ;;  %105 = vrot.lane.b32.xlu0 %v95_v15, %s259_s13 }
  0x9c   :  { %107 = vrot.lane.b32.xlu1 %v96_v16, %s259_s13  ;;  %117 = vrot.lane.b32.xlu0 %v93_v13, %s258_s0 }
  0xa0   :  { %119 = vrot.lane.b32.xlu1 %v94_v14, %s258_s0  ;;  %121 = vrot.lane.b32.xlu0 %v95_v15, %s258_s0 }
  0xa4   :  { %123 = vrot.lane.b32.xlu1 %v96_v16, %s258_s0  ;;  %141 = vrot.lane.b32.xlu0 %v133_v17, %s258_s0 }
  0xa8   :  { %143 = vrot.lane.b32.xlu1 %v134_v18, %s258_s0  ;;  %145 = vrot.lane.b32.xlu0 %v135_v19, %s258_s0 }
  0xac   :  { %147 = vrot.lane.b32.xlu1 %v136_v20, %s258_s0 }
  0xfe   :  { %v78_v21 = vpop.permute.xlu0 %77 }
  0xff   :  { %v89_v30 = vadd.f32 %v78_v21, %v69_v9 }
 0x102   :  { %v80_v22 = vpop.permute.xlu1 %79  ;;  %v82_v23 = vpop.permute.xlu0 %81 }
 0x103   :  { %v90_v34 = vadd.f32 %v80_v22, %v70_v11  ;;  %v91_v35 = vadd.f32 %v82_v23, %v71_v10 }
 0x106   :  { %v84_v24 = vpop.permute.xlu1 %83  ;;  %v102_v25 = vpop.permute.xlu0 %101 }
 0x107   :  { %v113_v33 = vadd.f32 %v102_v25, %v89_v30  ;;  %v92_v42 = vadd.f32 %v84_v24, %v72_v12 }
 0x10a   :  { %v104_v26 = vpop.permute.xlu1 %103  ;;  %v106_v27 = vpop.permute.xlu0 %105 }
 0x10b   :  { %v114_v39 = vadd.f32 %v104_v26, %v90_v34  ;;  %v115_v40 = vadd.f32 %v106_v27, %v91_v35 }
 0x10e   :  { %v108_v28 = vpop.permute.xlu1 %107  ;;  %v118_v29 = vpop.permute.xlu0 %117 }
 0x10f   :  { %v129_v36 = vsub.f32 %v113_v33, %v118_v29  ;;  %v116_v48 = vadd.f32 %v108_v28, %v92_v42 }
 0x112   :  { %v120_v31 = vpop.permute.xlu1 %119  ;;  %v122_v32 = vpop.permute.xlu0 %121 }
 0x113   :  { %v130_v43 = vsub.f32 %v114_v39, %v120_v31  ;;  %v131_v44 = vsub.f32 %v115_v40, %v122_v32 }
 0x116   :  { %v124_v37 = vpop.permute.xlu1 %123  ;;  %v142_v38 = vpop.permute.xlu0 %141 }
 0x117   :  { %v153_v41 = vsub.f32 %v129_v36, %v142_v38  ;;  %v132_v52 = vsub.f32 %v116_v48, %v124_v37 }
 0x119   :  { %v157_v45 = vsub.f32 %v153_v41, %v133_v17 }
 0x11a   :  { %v144_v46 = vpop.permute.xlu1 %143  ;;  %v146_v47 = vpop.permute.xlu0 %145 }
 0x11b   :  { %v161_v49 = vmul.f32 2.0, %v157_v45  ;;  %v154_v50 = vsub.f32 %v130_v43, %v144_v46  ;;  %v155_v51 = vsub.f32 %v131_v44, %v146_v47 }
 0x11d   :  { %v158_v53 = vsub.f32 %v154_v50, %v134_v18  ;;  %v159_v54 = vsub.f32 %v155_v51, %v135_v19  ;;  %169 = vrot.lane.b32.xlu0 %v161_v49, %s259_s13 }
 0x11e   :  { %v148_v55 = vpop.permute.xlu1 %147 }
 0x11f   :  { %v162_v56 = vmul.f32 2.0, %v158_v53  ;;  %v163_v57 = vmul.f32 2.0, %v159_v54  ;;  %v156_v58 = vsub.f32 %v132_v52, %v148_v55 }
 0x121   :  { %v160_v59 = vsub.f32 %v156_v58, %v136_v20  ;;  %171 = vrot.lane.b32.xlu1 %v162_v56, %s259_s13  ;;  %173 = vrot.lane.b32.xlu0 %v163_v57, %s259_s13 }
 0x123   :  { %v164_v60 = vmul.f32 2.0, %v160_v59 }
 0x125   :  { %175 = vrot.lane.b32.xlu1 %v164_v60, %s259_s13 }
 0x18f   :  { %v170_v61 = vpop.permute.xlu0 %169 }
 0x190   :  { %182 = vst.msk [vmem:[#allocation6] sm:$0xff] %vm181_vm6, %v170_v61 }
 0x193   :  { %v172_v62 = vpop.permute.xlu1 %171  ;;  %v174_v63 = vpop.permute.xlu0 %173 }
 0x194   :  { %183 = vst.msk [vmem:[#allocation6 + $0x8] sm:$0xff] %vm181_vm6, %v172_v62  ;;  %184 = vst.msk [vmem:[#allocation6 + $0x10] sm:$0xff] %vm181_vm6, %v174_v63 }
 0x197   :  { %v176_v0 = vpop.permute.xlu1 %175 }
 0x198   :  { %185 = vst.msk [vmem:[#allocation6 + $0x18] sm:$0xff] %vm181_vm6, %v176_v0 }
 0x199   :  { %241 = shalt.err (!%p238_p9)
}
 0x19a   :  { %197 = dma.vmem_to_hbm [thread:$0]  %s192_s15, 512, %s312_s1, [#allocation5], %s255_s9, %s255_s9, %s256_s10  }
 0x19b   :  { %252 = dma.done.wait [#allocation5], 512  }
 0x19c   :  { %253 = vsyncadd [#allocation5], 4294966784 }
 0x19d   :  { %201 = vsyncpa [#allocation4], 1 }
 0x19e   :  { %202 = vsyncpa [#allocation5], 1 }

</bundles_post_ra>
